<compile_context>
chip_gen: v6e
topology: v6e:2x2x1
jax: 0.10.0
libtpu: 0.0.40
codegen_flags: <defaults>
</compile_context>

<pallas_src>
import jax
import jax.numpy as jnp
import numpy as np
from jax import lax
from jax.experimental import pallas as pl
from jax.experimental.pallas import tpu as pltpu


def _round_up(a, b):
    return (a + b - 1) // b * b


def _fused_conv3x3_kernel(x_ref, w_ref, b_ref, o_ref):
    """One grid step: tile_h image rows of the fused 3x3 conv.

    x_ref: (tile_h, W+2, 3*Cin)  width-padded rows, channels stacked as (dy, cin)
    w_ref: (3, 3*Cin, Cout)      per-dx weight slab, rows ordered (dy, cin)
    b_ref: (1, Cout)             fully folded bias
    o_ref: (tile_h, W, Cout)
    """
    th, wp2, kdy = x_ref.shape
    w_out = wp2 - 2
    cout = o_ref.shape[-1]

    acc = None
    for dx in range(3):                       # static unroll: 3 MXU matmuls
        lhs = x_ref[:, dx:dx + w_out, :].reshape(th * w_out, kdy)
        part = jnp.dot(lhs, w_ref[dx], preferred_element_type=jnp.float32)
        acc = part if acc is None else acc + part
    acc = acc + b_ref[...]
    o_ref[...] = acc.reshape(th, w_out, cout).astype(o_ref.dtype)


def _pick_tile_h(B, H, W, Cin, Cout):
    """Largest divisor of H giving ~4096 pixels/step under a VMEM budget."""
    r8 = lambda v: _round_up(max(int(v), 1), 8)
    r128 = lambda v: _round_up(max(int(v), 1), 128)

    def step_bytes(th):
        x_blk = 2 * th * r8(W + 2) * r128(3 * Cin) * 4    # double-buffered input
        o_blk = 2 * th * r8(W) * r128(Cout) * 4           # double-buffered output
        acc = th * W * r128(Cout) * 4                     # f32 accumulator value
        wgt = 2 * 3 * r8(3 * Cin) * r128(Cout) * 4        # weights (tiny)
        return x_blk + o_blk + acc + wgt

    th = max(1, min(H, 4096 // max(W, 1)))
    while H % th:
        th -= 1
    budget = 24 * 1024 * 1024
    while th > 1 and step_bytes(th) > budget:
        th -= 1
        while H % th:
            th -= 1
    # v7x: two TensorCores split the "parallel" grid axis; prefer an even
    # number of steps when the grid would otherwise be odd (>1).
    steps = (B * H) // th
    if steps > 1 and steps % 2 == 1 and th % 2 == 0:
        th //= 2
    return th, step_bytes(th)


def upsampler_rep(x_nchw, params, upscale_factor=4):
    B, Cin, H, W = x_nchw.shape
    w1, b1 = params['w1'], params['b1']
    w3, b3 = params['w3'], params['b3']
    w11, b11 = params['w1x1'], params['b1x1']
    w33, b33 = params['w3x3'], params['b3x3']
    Cout = w1.shape[0]                       # out_channels * r^2
    r = upscale_factor
    oc = Cout // (r * r)
    f32 = jnp.float32

    # ---- fold the whole module into one 3x3 conv (wrapper-side precompute) ----
    w1_t = jnp.transpose(w1[:, :, 0, 0], (1, 0)).astype(f32)      # (Cin, Cout)
    w3_t = jnp.transpose(w3, (2, 3, 1, 0)).astype(f32)            # (3,3,Cin,Cout)
    w11_t = jnp.transpose(w11[:, :, 0, 0], (1, 0)).astype(f32)    # (Cin, C2)
    w33_t = jnp.transpose(w33, (2, 3, 1, 0)).astype(f32)          # (3,3,C2,Cout)

    w_eff = w3_t + jnp.einsum('ic,klcn->klin', w11_t, w33_t)      # (3,3,Cin,Cout)
    w_eff = w_eff.at[1, 1].add(w1_t)                              # centre tap += 1x1
    b_eff = (b1 + b3 + b33 + b11 @ w33_t.sum(axis=(0, 1))).astype(f32)   # (Cout,)

    # Per-dx weight slabs; row index = dy*Cin + ci  (matches the dy-stacked input)
    w_k = jnp.transpose(w_eff, (1, 0, 2, 3)).reshape(3, 3 * Cin, Cout)
    b_k = b_eff.reshape(1, Cout)

    # ---- dy-stacked, width-padded NHWC input (only 3x the input stream) ----
    x_nhwc = jnp.transpose(x_nchw, (0, 2, 3, 1)).astype(f32)      # (B,H,W,Cin)
    xp = jnp.pad(x_nhwc, ((0, 0), (1, 1), (1, 1), (0, 0)))        # (B,H+2,W+2,Cin)
    xcat = jnp.concatenate([xp[:, dy:dy + H] for dy in range(3)], axis=-1)
    xcat = xcat.reshape(B * H, W + 2, 3 * Cin)                    # (B*H,W+2,3Cin)

    # ---- tiling: tile_h rows per step, tile_h | H (no padding, no tail tile) ----
    tile_h, step_bytes = _pick_tile_h(B, H, W, Cin, Cout)
    n_steps = (B * H) // tile_h
    vmem_limit = int(min(48 * 1024 * 1024,
                         max(32 * 1024 * 1024, step_bytes + (4 << 20))))

    out_flat = pl.pallas_call(
        _fused_conv3x3_kernel,
        out_shape=jax.ShapeDtypeStruct((B * H, W, Cout), f32),
        grid=(n_steps,),
        in_specs=[
            pl.BlockSpec((tile_h, W + 2, 3 * Cin), lambda i: (i, 0, 0)),
            pl.BlockSpec((3, 3 * Cin, Cout), lambda i: (0, 0, 0)),
            pl.BlockSpec((1, Cout), lambda i: (0, 0)),
        ],
        out_specs=pl.BlockSpec((tile_h, W, Cout), lambda i: (i, 0, 0)),
        compiler_params=pltpu.CompilerParams(
            dimension_semantics=("parallel",),
            vmem_limit_bytes=vmem_limit,
        ),
    )(xcat, w_k, b_k)

    # ---- PixelShuffle (channel order is native (oc, r1, r2)), back to NCHW ----
    out = out_flat.reshape(B, H, W, oc, r, r)
    out = jnp.transpose(out, (0, 3, 1, 4, 2, 5)).reshape(B, oc, H * r, W * r)
    return out


def reference(x, params, r=4):
    """Pure-JAX NCHW reference matching the PyTorch forward exactly."""
    def conv(x, w, b, pad):
        y = lax.conv_general_dilated(
            x, w, (1, 1), [(pad, pad), (pad, pad)],
            dimension_numbers=('NCHW', 'OIHW', 'NCHW'))
        return y + b.reshape(1, -1, 1, 1)

    v1 = conv(x, params['w1x1'], params['b1x1'], 0)
    v1 = jnp.pad(v1, ((0, 0), (0, 0), (1, 1), (1, 1)))
    b0 = params['b1x1'].reshape(1, -1, 1, 1)
    v1 = v1.at[:, :, 0:1, :].set(jnp.broadcast_to(b0, v1[:, :, 0:1, :].shape))
    v1 = v1.at[:, :, -1:, :].set(jnp.broadcast_to(b0, v1[:, :, -1:, :].shape))
    v1 = v1.at[:, :, :, 0:1].set(jnp.broadcast_to(b0, v1[:, :, :, 0:1].shape))
    v1 = v1.at[:, :, :, -1:].set(jnp.broadcast_to(b0, v1[:, :, :, -1:].shape))
    v2 = conv(v1, params['w3x3'], params['b3x3'], 0)
    out = (conv(x, params['w1'], params['b1'], 0)
           + conv(x, params['w3'], params['b3'], 1) + v2)
    B, C, H, W = out.shape
    oc = C // (r * r)
    out = out.reshape(B, oc, r, r, H, W)
    out = jnp.transpose(out, (0, 1, 4, 2, 5, 3))
    return out.reshape(B, oc, H * r, W * r)


if __name__ == "__main__":
    key = jax.random.PRNGKey(0)
    B, Cin, H, W = 2, 4, 16, 16
    oc, r = 4, 4
    Cout = oc * r * r
    C2 = 2 * Cin
    ks = jax.random.split(key, 9)
    params = {
        'w1':   0.1 * jax.random.normal(ks[0], (Cout, Cin, 1, 1), jnp.float32),
        'b1':   0.1 * jax.random.normal(ks[1], (Cout,), jnp.float32),
        'w3':   0.1 * jax.random.normal(ks[2], (Cout, Cin, 3, 3), jnp.float32),
        'b3':   0.1 * jax.random.normal(ks[3], (Cout,), jnp.float32),
        'w1x1': 0.1 * jax.random.normal(ks[4], (C2, Cin, 1, 1), jnp.float32),
        'b1x1': 0.1 * jax.random.normal(ks[5], (C2,), jnp.float32),
        'w3x3': 0.1 * jax.random.normal(ks[6], (Cout, C2, 3, 3), jnp.float32),
        'b3x3': 0.1 * jax.random.normal(ks[7], (Cout,), jnp.float32),
    }
    x = jax.random.normal(ks[8], (B, Cin, H, W), jnp.float32)

    out = upsampler_rep(x, params, upscale_factor=r)
    out = jax.block_until_ready(out)

    ref = reference(x, params, r=r)
    np.testing.assert_allclose(np.asarray(out), np.asarray(ref),
                               rtol=2e-4, atol=2e-4)
    assert out.shape == (B, oc, H * r, W * r)
    print("KERNEL_OK")
</pallas_src>

<mosaic_0001>
module attributes {stable_mosaic.version = 11 : i64} {
  func.func @_fused_conv3x3_kernel(%arg0: i32, %arg1: memref<16x18x12xf32, #tpu.memory_space<vmem>>, %arg2: memref<3x12x64xf32, #tpu.memory_space<vmem>>, %arg3: memref<1x64xf32, #tpu.memory_space<vmem>>, %arg4: memref<16x16x64xf32, #tpu.memory_space<vmem>>) attributes {dimension_semantics = [#tpu.dimension_semantics<parallel>], iteration_bounds = array<i64: 2>, scalar_prefetch = 0 : i64, scratch_operands = 0 : i64, tpu.core_type = #tpu.core_type<tc>, window_params = [{transform_indices = @transform_0, window_bounds = array<i64: 16, 18, 12>}, {pipeline_mode = #tpu.pipeline_mode<synchronous>, transform_indices = @transform_1, window_bounds = array<i64: 3, 12, 64>}, {pipeline_mode = #tpu.pipeline_mode<synchronous>, transform_indices = @transform_2, window_bounds = array<i64: 1, 64>}, {transform_indices = @transform_3, window_bounds = array<i64: 16, 16, 64>}]} {
    %c0 = arith.constant 0 : index
    %c0_0 = arith.constant 0 : index
    %c0_1 = arith.constant 0 : index
    %0 = vector.load %arg1[%c0, %c0_0, %c0_1] : memref<16x18x12xf32, #tpu.memory_space<vmem>>, vector<16x16x12xf32>
    %1 = vector.shape_cast %0 : vector<16x16x12xf32> to vector<256x12xf32>
    %c0_2 = arith.constant 0 : index
    %c0_3 = arith.constant 0 : index
    %c0_4 = arith.constant 0 : index
    %2 = vector.load %arg2[%c0_2, %c0_3, %c0_4] : memref<3x12x64xf32, #tpu.memory_space<vmem>>, vector<1x12x64xf32>
    %3 = vector.shape_cast %2 : vector<1x12x64xf32> to vector<12x64xf32>
    %cst = arith.constant dense<0.000000e+00> : vector<256x64xf32>
    %4 = tpu.matmul %1, %3, %cst {dimension_numbers = #tpu.dot_dimension_numbers<[1], [0], [0], [1], [0, 0, 1, 1], [], []>} : vector<256x12xf32>, vector<12x64xf32>, vector<256x64xf32> -> vector<256x64xf32>
    %c0_5 = arith.constant 0 : index
    %c1 = arith.constant 1 : index
    %c0_6 = arith.constant 0 : index
    %5 = vector.load %arg1[%c0_5, %c1, %c0_6] : memref<16x18x12xf32, #tpu.memory_space<vmem>>, vector<16x16x12xf32>
    %6 = vector.shape_cast %5 : vector<16x16x12xf32> to vector<256x12xf32>
    %c1_7 = arith.constant 1 : index
    %c0_8 = arith.constant 0 : index
    %c0_9 = arith.constant 0 : index
    %7 = vector.load %arg2[%c1_7, %c0_8, %c0_9] : memref<3x12x64xf32, #tpu.memory_space<vmem>>, vector<1x12x64xf32>
    %8 = vector.shape_cast %7 : vector<1x12x64xf32> to vector<12x64xf32>
    %cst_10 = arith.constant dense<0.000000e+00> : vector<256x64xf32>
    %9 = tpu.matmul %6, %8, %cst_10 {dimension_numbers = #tpu.dot_dimension_numbers<[1], [0], [0], [1], [0, 0, 1, 1], [], []>} : vector<256x12xf32>, vector<12x64xf32>, vector<256x64xf32> -> vector<256x64xf32>
    %10 = arith.addf %4, %9 : vector<256x64xf32>
    %c0_11 = arith.constant 0 : index
    %c2 = arith.constant 2 : index
    %c0_12 = arith.constant 0 : index
    %11 = vector.load %arg1[%c0_11, %c2, %c0_12] : memref<16x18x12xf32, #tpu.memory_space<vmem>>, vector<16x16x12xf32>
    %12 = vector.shape_cast %11 : vector<16x16x12xf32> to vector<256x12xf32>
    %c2_13 = arith.constant 2 : index
    %c0_14 = arith.constant 0 : index
    %c0_15 = arith.constant 0 : index
    %13 = vector.load %arg2[%c2_13, %c0_14, %c0_15] : memref<3x12x64xf32, #tpu.memory_space<vmem>>, vector<1x12x64xf32>
    %14 = vector.shape_cast %13 : vector<1x12x64xf32> to vector<12x64xf32>
    %cst_16 = arith.constant dense<0.000000e+00> : vector<256x64xf32>
    %15 = tpu.matmul %12, %14, %cst_16 {dimension_numbers = #tpu.dot_dimension_numbers<[1], [0], [0], [1], [0, 0, 1, 1], [], []>} : vector<256x12xf32>, vector<12x64xf32>, vector<256x64xf32> -> vector<256x64xf32>
    %16 = arith.addf %10, %15 : vector<256x64xf32>
    %c0_17 = arith.constant 0 : index
    %c0_18 = arith.constant 0 : index
    %17 = vector.load %arg3[%c0_17, %c0_18] : memref<1x64xf32, #tpu.memory_space<vmem>>, vector<1x64xf32>
    %18 = vector.broadcast %17 : vector<1x64xf32> to vector<256x64xf32>
    %19 = arith.addf %16, %18 : vector<256x64xf32>
    %20 = vector.shape_cast %19 : vector<256x64xf32> to vector<16x16x64xf32>
    %c0_19 = arith.constant 0 : index
    %c0_20 = arith.constant 0 : index
    %c0_21 = arith.constant 0 : index
    %21 = vector.load %arg4[%c0_19, %c0_20, %c0_21] : memref<16x16x64xf32, #tpu.memory_space<vmem>>, vector<16x16x64xf32>
    tpu.vector_store %arg4[%c0_19, %c0_20, %c0_21], %20 {strides = array<i32>} : memref<16x16x64xf32, #tpu.memory_space<vmem>>, vector<16x16x64xf32>,
    return
  }
  func.func @transform_0(%arg0: i32) -> (i32, i32, i32) {
    %c0_i32 = arith.constant 0 : i32
    %c0_i32_0 = arith.constant 0 : i32
    %c0_i32_1 = arith.constant 0 : i32
    return %arg0, %c0_i32, %c0_i32_0 : i32, i32, i32
  }
  func.func @transform_1(%arg0: i32) -> (i32, i32, i32) {
    %c0_i32 = arith.constant 0 : i32
    %c0_i32_0 = arith.constant 0 : i32
    %c0_i32_1 = arith.constant 0 : i32
    %c0_i32_2 = arith.constant 0 : i32
    return %c0_i32, %c0_i32_0, %c0_i32_1 : i32, i32, i32
  }
  func.func @transform_2(%arg0: i32) -> (i32, i32) {
    %c0_i32 = arith.constant 0 : i32
    %c0_i32_0 = arith.constant 0 : i32
    %c0_i32_1 = arith.constant 0 : i32
    return %c0_i32, %c0_i32_0 : i32, i32
  }
  func.func @transform_3(%arg0: i32) -> (i32, i32, i32) {
    %c0_i32 = arith.constant 0 : i32
    %c0_i32_0 = arith.constant 0 : i32
    %c0_i32_1 = arith.constant 0 : i32
    return %arg0, %c0_i32, %c0_i32_0 : i32, i32, i32
  }
}

</mosaic_0001>

<bundles_post_ra>
// kernel: tpu_custom_call.1
= control target key start
LH: loop header
LB: loop body
LE: loop exit
PB: predicated region body
PF: predicated region fallthrough
CT: control target
= control target key end

     0   :  { %8 = vsyncpa [#allocation3], 0  ;;  %s2446_s0 = inlined_call_operand.vmem [shape: f32[32,18,12], index: 0, kind: input, shape index: {}]   ;;  %s2447_s1 = inlined_call_operand.vmem [shape: f32[3,12,64], index: 1, kind: input, shape index: {}]   ;;  %s2448_s2 = inlined_call_operand.vmem [shape: f32[1,64], index: 2, kind: input, shape index: {}]   ;;  %s2449_s3 = inlined_call_operand.hbm [shape: f32[32,16,64], index: 3, kind: output, shape index: {}]  }
   0x1   :  { %10 = vsyncpa [#allocation3 + $0x1], 0  ;;  %s1942_s12 = smov 0   ;;  %s1944_s13 = smov 0  }
   0x2   :  { %s1946_s14 = smov 0   ;;  %s1948_s15 = smov 0  }
   0x3 LB: > { %s1963_s16 = sadd.s32 4294967295, %s1917_s15   ;;  %s1434_s17 = sadd.s32 4294967294, %s1917_s15   ;;  %s1917_s15 = sphi %s1948_s15, %s2455_s15   ;;  %s1913_s14 = sphi %s1946_s14, %s2454_s14   ;;  %s1909_s13 = sphi %s1944_s13, %s2453_s13   ;;  %s1905_s12 = sphi %s1942_s12, %s2452_s12  }
   0x4   : > { %s1967_s18 = sadd.s32 1, %s1917_s15   ;;  %s91_s19 = sadd.s32 1, %s1913_s14 }
   0x5   : > { %s88_s20 = ssub.s32 %s1917_s15, %s1967_s18  ;;  %p101_p0 = scmp.ne.s32.totalorder %s1913_s14, %s1909_s13 }
   0x6   : > { %p89_p1 = scmp.eq.s32.totalorder %s88_s20, 0  ;;  %p102_p2 = scmp.eq.s32.totalorder %s1963_s16, 1 }
   0x7   : > { %p107_p3 = scmp.ne.s32.totalorder %s1909_s13, %s1905_s12  ;;  %p108_p4 = scmp.eq.s32.totalorder %s1434_s17, 1 }
   0x8   : > { %s1978_s21 = scalar_select %p89_p1, %s1913_s14, %s91_s19  }
   0x9   : > { %p1980_p5 = por %p102_p2, %p101_p0  ;;  %p1984_p6 = por %p108_p4, %p107_p3 }
   0xa   : > { %p1437_p7 = scmp.ge.s32.totalorder %s1917_s15, 1  ;;  %p142_p8 = scmp.lt.s32.totalorder %s1917_s15, 3 }
   0xc   : > { %p143_p9 = pnand %p1437_p7, %p142_p8 }
   0xd   : > { %s1439_s28 = sshll.u32 (!%p143_p9), %s1963_s16, 4  ;;  %s164_s20 = sand.u32 (!%p143_p9), 1, %s1909_s13  }
   0xe   : > { %146 = sbr.rel (%p143_p9) target bundleno = 334 (0x14e), region = 32  ;;  %p168_p10 = scmp.lt.s32.totalorder (!%p143_p9), %s1439_s28, 31 }
   0xf   : > { %s1438_s24 = sshll.u32 (!%p143_p9), %s164_s20, 8  ;;  %s1919_s7 = smov (!%p143_p9), [#allocation2]  }
  0x10   : > { %s2273_s27 = scalar_lea.vmem (!%p143_p9), [#allocation2], %s1438_s24  ;;  %s1861_s8 = sshll.u32 (!%p143_p9), %s1919_s7, 4  ;;  %s1862_s8 = int_to_ptr.vmem [resolvable:$false] %s1861_s8 }
  0x11   : > { %s1372_s29 = sshll.u32 (!%p143_p9), %s2273_s27, 4  ;;  %s2397_s29 = int_to_ptr.vmem [resolvable:$true] %s1372_s29 }
  0x12   : > { %p1864_p0 = scmp.lt.s32.totalorder (!%p143_p9), %s2397_s29, %s1862_s8 }
  0x13   : > { %v1442_v0 = vld [vmem:[%s2447_s1 + $0x18] sm:$0xf]  ;;  %vm341_vm0 = vcmask 1043456   ;;  %v1441_v1 = vld [vmem:[%s2447_s1 + $0x10] sm:$0xff]  ;;  %v208_v2 = vld [vmem:[%s2447_s1 + $0x8] sm:$0xf] }
  0x14   : > { %1811 = vmatprep.subr.msk.mxu1 %vm341_vm0, %v1442_v0  ;;  %1655 = vmatprep.subr.msk.mxu0 %vm341_vm0, %v1442_v0  ;;  %v1510_v3 = vld [vmem:[%s2447_s1 + $0x28] sm:$0xf]  ;;  %s2457_s28 = smov (!%p168_p10, %s1439_s28), 31  ;;  %vm244_vm1 = vcmask 97280   ;;  %v207_v10 = vld [vmem:[%s2447_s1] sm:$0xff]  ;;  %vm1324_vm2 = vcmask 523264  }
  0x15   : > { %1813 = vmatpush3.msk.msra.mxu1 %vm341_vm0, %v1442_v0  ;;  %1656 = vmatpush3.msk.msra.mxu0 %vm341_vm0, %v1442_v0  ;;  %s1815_s6 = smul.u32 24, %s2457_s28  ;;  %v1509_v11 = vld [vmem:[%s2447_s1 + $0x20] sm:$0xff]  ;;  %s1552_s28 = sshll.u32 %s1963_s16, 12 }
  0x16   : > { %1812 = vmatprep.subr.mxu1 %v1441_v1  ;;  %1657 = vmatprep.subr.mxu0 %v1441_v1  ;;  %s2395_s5 = scalar_lea.hbm %s2449_s3, %s1552_s28  ;;  %s2406_s16 = scalar_lea.sflag [#allocation3], %s164_s20 }
  0x17   : > { %1814 = vmatpush3.msra.mxu1 %v1441_v1  ;;  %1658 = vmatpush3.msra.mxu0 %v1441_v1  ;;  %s2012_s9 = scalar_lea.vmem %s2446_s0, %s1815_s6  ;;  %s1857_s6 = scalar_lea.vmem %s2397_s29, 4096 }
  0x18   : > { %1707 = vmatprep.subr.msk.mxu1 %vm341_vm0, %v208_v2  ;;  %1759 = vmatprep.subr.msk.mxu0 %vm341_vm0, %v1510_v3  ;;  %v209_v4 = vld [vmem:[%s2012_s9 + $0x1] sm:$0xff]  ;;  %v210_v6 = vld [vmem:[%s2012_s9 + $0x9] sm:$0xff]  ;;  %v211_v8 = vld [vmem:[%s2012_s9 + $0x19] sm:$0xff]  ;;  %p1858_p11 = scmp.ne.s32.totalorder %s2397_s29, %s1857_s6 }
  0x19   : > { %v225_v5 = vld [vmem:[%s2012_s9 + $0xc1] sm:$0xff]  ;;  %1659 = vmatprep.mubr.msk.f32.mxu0 %vm244_vm1, %v209_v4  ;;  %v226_v7 = vld [vmem:[%s2012_s9 + $0xc9] sm:$0xff]  ;;  %v227_v9 = vld [vmem:[%s2012_s9 + $0xd9] sm:$0xff] }
  0x1a   : > { %1683 = vmatprep.mubr.msk.f32.mxu1 %vm244_vm1, %v225_v5  ;;  %1660 = vmatmul.mubr.msk.f32.vlgmr.msra.gmra.mxu0 %vm244_vm1, %v210_v6  ;;  %v212_v12 = vld [vmem:[%s2012_s9 + $0x21] sm:$0xff]  ;;  %v213_v14 = vld [vmem:[%s2012_s9 + $0x31] sm:$0xff]  ;;  %v214_v16 = vld [vmem:[%s2012_s9 + $0x39] sm:$0xff]  ;;  %p1859_p12 = pnand %p1858_p11, %p1980_p5 }
  0x1b   : > { %1684 = vmatmul.mubr.msk.f32.vlgmr.msra.gmra.mxu1 %vm244_vm1, %v226_v7  ;;  %1760 = vmatpush3.msk.msra.mxu0 %vm341_vm0, %v1510_v3  ;;  %v228_v13 = vld [vmem:[%s2012_s9 + $0xe1] sm:$0xff]  ;;  %v229_v15 = vld [vmem:[%s2012_s9 + $0xf1] sm:$0xff]  ;;  %v230_v17 = vld [vmem:[%s2012_s9 + $0xf9] sm:$0xff] }
  0x1c   : > { %1708 = vmatpush3.msk.msra.mxu1 %vm341_vm0, %v208_v2  ;;  %1662 = vmatprep.mubr.msk.f32.mxu0 %vm244_vm1, %v211_v8  ;;  %v215_v18 = vld [vmem:[%s2012_s9 + $0x49] sm:$0xff]  ;;  %v216_v20 = vld [vmem:[%s2012_s9 + $0x51] sm:$0xff]  ;;  %v217_v22 = vld [vmem:[%s2012_s9 + $0x61] sm:$0xff]  ;;  %p1860_p13 = pneg %p1859_p12 }
  0x1d   : > { %1686 = vmatprep.mubr.msk.f32.mxu1 %vm244_vm1, %v227_v9  ;;  %1709 = vmatprep.subr.mxu1 %v207_v10  ;;  %v231_v19 = vld [vmem:[%s2012_s9 + $0x109] sm:$0xff]  ;;  %v232_v21 = vld [vmem:[%s2012_s9 + $0x111] sm:$0xff]  ;;  %v233_v23 = vld [vmem:[%s2012_s9 + $0x121] sm:$0xff] }
  0x1e   : > { %1761 = vmatprep.subr.mxu0 %v1509_v11  ;;  %1663 = vmatmul.mubr.msk.f32.gmra.mxu0 %vm244_vm1, %v212_v12  ;;  %v218_v24 = vld [vmem:[%s2012_s9 + $0x69] sm:$0xff]  ;;  %v219_v26 = vld [vmem:[%s2012_s9 + $0x79] sm:$0xff]  ;;  %v220_v28 = vld [vmem:[%s2012_s9 + $0x81] sm:$0xff] }
  0x1f   : > { %1687 = vmatmul.mubr.msk.f32.gmra.mxu1 %vm244_vm1, %v228_v13  ;;  %1665 = vmatprep.mubr.msk.f32.mxu0 %vm244_vm1, %v213_v14  ;;  %v234_v25 = vld [vmem:[%s2012_s9 + $0x129] sm:$0xff]  ;;  %v235_v27 = vld [vmem:[%s2012_s9 + $0x139] sm:$0xff]  ;;  %v236_v29 = vld [vmem:[%s2012_s9 + $0x141] sm:$0xff] }
  0x20   : > { %1689 = vmatprep.mubr.msk.f32.mxu1 %vm244_vm1, %v229_v15  ;;  %1710 = vmatpush3.msra.mxu1 %v207_v10  ;;  %v221_v30 = vld [vmem:[%s2012_s9 + $0x91] sm:$0xff]  ;;  %v222_v32 = vld [vmem:[%s2012_s9 + $0x99] sm:$0xff]  ;;  %v223_v34 = vld [vmem:[%s2012_s9 + $0xa9] sm:$0xff] }
  0x21   : > { %1762 = vmatpush3.msra.mxu0 %v1509_v11  ;;  %v237_v31 = vld [vmem:[%s2012_s9 + $0x151] sm:$0xff]  ;;  %v238_v33 = vld [vmem:[%s2012_s9 + $0x159] sm:$0xff]  ;;  %v239_v35 = vld [vmem:[%s2012_s9 + $0x169] sm:$0xff] }
  0x22   : > { %1666 = vmatmul.mubr.msk.f32.gmra.mxu0 %vm244_vm1, %v214_v16  ;;  %v224_v36 = vld [vmem:[%s2012_s9 + $0xb1] sm:$0xff]  ;;  %v175_v38 = vld [vmem:[%s2012_s9] sm:$0xff]  ;;  %v176_v40 = vld [vmem:[%s2012_s9 + $0x8] sm:$0xff] }
  0x23   : > { %1690 = vmatmul.mubr.msk.f32.gmra.mxu1 %vm244_vm1, %v230_v17  ;;  %1668 = vmatprep.mubr.msk.f32.mxu0 %vm244_vm1, %v215_v18  ;;  %v240_v37 = vld [vmem:[%s2012_s9 + $0x171] sm:$0xff]  ;;  %v894_v39 = vld [vmem:[%s2012_s9 + $0x2] sm:$0xff]  ;;  %v896_v43 = vld [vmem:[%s2012_s9 + $0x1a] sm:$0xff] }
  0x24   : > { %1692 = vmatprep.mubr.msk.f32.mxu1 %vm244_vm1, %v231_v19  ;;  %v895_v41 = vld [vmem:[%s2012_s9 + $0xa] sm:$0xff]  ;;  %v177_v42 = vld [vmem:[%s2012_s9 + $0x18] sm:$0xff]  ;;  %v178_v44 = vld [vmem:[%s2012_s9 + $0x20] sm:$0xff] }
  0x25   : > { %v897_v45 = vld [vmem:[%s2012_s9 + $0x22] sm:$0xff]  ;;  %v179_v46 = vld [vmem:[%s2012_s9 + $0x30] sm:$0xff]  ;;  %v180_v48 = vld [vmem:[%s2012_s9 + $0x38] sm:$0xff] }
  0x26   : > { %1669 = vmatmul.mubr.msk.f32.gmra.mxu0 %vm244_vm1, %v216_v20  ;;  %v898_v47 = vld [vmem:[%s2012_s9 + $0x32] sm:$0xff]  ;;  %v899_v49 = vld [vmem:[%s2012_s9 + $0x3a] sm:$0xff]  ;;  %v181_v50 = vld [vmem:[%s2012_s9 + $0x48] sm:$0xff] }
  0x27   : > { %1693 = vmatmul.mubr.msk.f32.gmra.mxu1 %vm244_vm1, %v232_v21  ;;  %1671 = vmatprep.mubr.msk.f32.mxu0 %vm244_vm1, %v217_v22  ;;  %v900_v51 = vld [vmem:[%s2012_s9 + $0x4a] sm:$0xff]  ;;  %v901_v53 = vld [vmem:[%s2012_s9 + $0x52] sm:$0xff]  ;;  %v183_v54 = vld [vmem:[%s2012_s9 + $0x60] sm:$0xff] }
  0x28   : > { %1695 = vmatprep.mubr.msk.f32.mxu1 %vm244_vm1, %v233_v23  ;;  %v182_v52 = vld [vmem:[%s2012_s9 + $0x50] sm:$0xff]  ;;  %v902_v55 = vld [vmem:[%s2012_s9 + $0x62] sm:$0xff]  ;;  %v185_v58 = vld [vmem:[%s2012_s9 + $0x78] sm:$0xff] }
  0x29   : > { %v184_v56 = vld [vmem:[%s2012_s9 + $0x68] sm:$0xff]  ;;  %v904_v59 = vld [vmem:[%s2012_s9 + $0x7a] sm:$0xff]  ;;  %v187_v62 = vld [vmem:[%s2012_s9 + $0x90] sm:$0xff] }
  0x2a   : > { %1672 = vmatmul.mubr.msk.f32.gmra.mxu0 %vm244_vm1, %v218_v24  ;;  %v903_v57 = vld [vmem:[%s2012_s9 + $0x6a] sm:$0xff]  ;;  %v186_v60 = vld [vmem:[%s2012_s9 + $0x80] sm:$0xff]  ;;  %v906_v63 = vld [vmem:[%s2012_s9 + $0x92] sm:$0xff] }
  0x2b   : > { %1696 = vmatmul.mubr.msk.f32.gmra.mxu1 %vm244_vm1, %v234_v25  ;;  %1674 = vmatprep.mubr.msk.f32.mxu0 %vm244_vm1, %v219_v26  ;;  %v905_v61 = vld [vmem:[%s2012_s9 + $0x82] sm:$0xff]  ;;  %v188_v0 = vld [vmem:[%s2012_s9 + $0x98] sm:$0xff]  ;;  %v908_v3 = vld [vmem:[%s2012_s9 + $0xaa] sm:$0xff] }
  0x2c   : > { %1698 = vmatprep.mubr.msk.f32.mxu1 %vm244_vm1, %v235_v27  ;;  %v907_v1 = vld [vmem:[%s2012_s9 + $0x9a] sm:$0xff]  ;;  %v189_v2 = vld [vmem:[%s2012_s9 + $0xa8] sm:$0xff]  ;;  %v190_v4 = vld [vmem:[%s2012_s9 + $0xb0] sm:$0xff] }
  0x2d   : > { %v909_v5 = vld [vmem:[%s2012_s9 + $0xb2] sm:$0xff]  ;;  %v191_v6 = vld [vmem:[%s2012_s9 + $0xc0] sm:$0xff]  ;;  %v192_v8 = vld [vmem:[%s2012_s9 + $0xc8] sm:$0xff] }
  0x2e   : > { %1675 = vmatmul.mubr.msk.f32.gmra.mxu0 %vm244_vm1, %v220_v28  ;;  %v910_v7 = vld [vmem:[%s2012_s9 + $0xc2] sm:$0xff]  ;;  %v911_v9 = vld [vmem:[%s2012_s9 + $0xca] sm:$0xff]  ;;  %v193_v10 = vld [vmem:[%s2012_s9 + $0xd8] sm:$0xff] }
  0x2f   : > { %1699 = vmatmul.mubr.msk.f32.gmra.mxu1 %vm244_vm1, %v236_v29  ;;  %1677 = vmatprep.mubr.msk.f32.mxu0 %vm244_vm1, %v221_v30  ;;  %v912_v11 = vld [vmem:[%s2012_s9 + $0xda] sm:$0xff]  ;;  %v913_v13 = vld [vmem:[%s2012_s9 + $0xe2] sm:$0xff]  ;;  %v195_v14 = vld [vmem:[%s2012_s9 + $0xf0] sm:$0xff] }
  0x30   : > { %1701 = vmatprep.mubr.msk.f32.mxu1 %vm244_vm1, %v237_v31  ;;  %v194_v12 = vld [vmem:[%s2012_s9 + $0xe0] sm:$0xff]  ;;  %v914_v15 = vld [vmem:[%s2012_s9 + $0xf2] sm:$0xff]  ;;  %v197_v18 = vld [vmem:[%s2012_s9 + $0x108] sm:$0xff] }
  0x31   : > { %v196_v16 = vld [vmem:[%s2012_s9 + $0xf8] sm:$0xff]  ;;  %v916_v19 = vld [vmem:[%s2012_s9 + $0x10a] sm:$0xff]  ;;  %v199_v22 = vld [vmem:[%s2012_s9 + $0x120] sm:$0xff] }
  0x32   : > { %1678 = vmatmul.mubr.msk.f32.gmra.mxu0 %vm244_vm1, %v222_v32  ;;  %v915_v17 = vld [vmem:[%s2012_s9 + $0xfa] sm:$0xff]  ;;  %v198_v20 = vld [vmem:[%s2012_s9 + $0x110] sm:$0xff]  ;;  %v918_v23 = vld [vmem:[%s2012_s9 + $0x122] sm:$0xff] }
  0x33   : > { %1702 = vmatmul.mubr.msk.f32.gmra.mxu1 %vm244_vm1, %v238_v33  ;;  %1680 = vmatprep.mubr.msk.f32.mxu0 %vm244_vm1, %v223_v34  ;;  %v917_v21 = vld [vmem:[%s2012_s9 + $0x112] sm:$0xff]  ;;  %v200_v24 = vld [vmem:[%s2012_s9 + $0x128] sm:$0xff]  ;;  %v920_v27 = vld [vmem:[%s2012_s9 + $0x13a] sm:$0xff] }
  0x34   : > { %1704 = vmatprep.mubr.msk.f32.mxu1 %vm244_vm1, %v239_v35  ;;  %v919_v25 = vld [vmem:[%s2012_s9 + $0x12a] sm:$0xff]  ;;  %v201_v26 = vld [vmem:[%s2012_s9 + $0x138] sm:$0xff]  ;;  %v202_v28 = vld [vmem:[%s2012_s9 + $0x140] sm:$0xff] }
  0x35   : > { %v921_v29 = vld [vmem:[%s2012_s9 + $0x142] sm:$0xff]  ;;  %v203_v30 = vld [vmem:[%s2012_s9 + $0x150] sm:$0xff]  ;;  %v204_v32 = vld [vmem:[%s2012_s9 + $0x158] sm:$0xff] }
  0x36   : > { %1681 = vmatmul.mubr.msk.f32.gmra.mxu0 %vm244_vm1, %v224_v36  ;;  %v922_v31 = vld [vmem:[%s2012_s9 + $0x152] sm:$0xff]  ;;  %v923_v33 = vld [vmem:[%s2012_s9 + $0x15a] sm:$0xff]  ;;  %v205_v34 = vld [vmem:[%s2012_s9 + $0x168] sm:$0xff] }
  0x37   : > { %1705 = vmatmul.mubr.msk.f32.gmra.mxu1 %vm244_vm1, %v240_v37  ;;  %1763 = vmatprep.mubr.msk.f32.mxu0 %vm244_vm1, %v894_v39  ;;  %v924_v35 = vld [vmem:[%s2012_s9 + $0x16a] sm:$0xff]  ;;  %v925_v37 = vld [vmem:[%s2012_s9 + $0x172] sm:$0xff] }
  0x38   : > { %1711 = vmatprep.mubr.msk.f32.mxu1 %vm244_vm1, %v175_v38  ;;  %v206_v36 = vld [vmem:[%s2012_s9 + $0x170] sm:$0xff]  ;;  %s1863_s9 = scalar_lea.vmem %s1862_s8, 8192 }
  0x39   : > { %p1865_p1 = scmp.lt.s32.totalorder %s1863_s9, %s1857_s6 }
  0x3a   : > { %1764 = vmatmul.mubr.msk.f32.vlgmr.msra.gmra.mxu0 %vm244_vm1, %v895_v41 }
  0x3b   : > { %1712 = vmatmul.mubr.msk.f32.vlgmr.msra.gmra.mxu1 %vm244_vm1, %v176_v40  ;;  %1766 = vmatprep.mubr.msk.f32.mxu0 %vm244_vm1, %v896_v43  ;;  %p1866_p2 = por %p1865_p1, %p1864_p0 }
  0x3c   : > { %1714 = vmatprep.mubr.msk.f32.mxu1 %vm244_vm1, %v177_v42 }
  0x3d   : > { %p1867_p3 = pnand %p1866_p2, %p1860_p13 }
  0x3e   : > { %1767 = vmatmul.mubr.msk.f32.gmra.mxu0 %vm244_vm1, %v897_v45 }
  0x3f   : > { %1715 = vmatmul.mubr.msk.f32.gmra.mxu1 %vm244_vm1, %v178_v44  ;;  %1769 = vmatprep.mubr.msk.f32.mxu0 %vm244_vm1, %v898_v47 }
  0x40   : > { %1717 = vmatprep.mubr.msk.f32.mxu1 %vm244_vm1, %v179_v46 }
  0x42   : > { %1770 = vmatmul.mubr.msk.f32.gmra.mxu0 %vm244_vm1, %v899_v49 }
  0x43   : > { %1718 = vmatmul.mubr.msk.f32.gmra.mxu1 %vm244_vm1, %v180_v48  ;;  %1772 = vmatprep.mubr.msk.f32.mxu0 %vm244_vm1, %v900_v51 }
  0x44   : > { %1720 = vmatprep.mubr.msk.f32.mxu1 %vm244_vm1, %v181_v50 }
  0x46   : > { %1773 = vmatmul.mubr.msk.f32.gmra.mxu0 %vm244_vm1, %v901_v53 }
  0x47   : > { %1721 = vmatmul.mubr.msk.f32.gmra.mxu1 %vm244_vm1, %v182_v52  ;;  %1775 = vmatprep.mubr.msk.f32.mxu0 %vm244_vm1, %v902_v55 }
  0x48   : > { %1723 = vmatprep.mubr.msk.f32.mxu1 %vm244_vm1, %v183_v54 }
  0x4a   : > { %1776 = vmatmul.mubr.msk.f32.gmra.mxu0 %vm244_vm1, %v903_v57 }
  0x4b   : > { %1724 = vmatmul.mubr.msk.f32.gmra.mxu1 %vm244_vm1, %v184_v56  ;;  %1778 = vmatprep.mubr.msk.f32.mxu0 %vm244_vm1, %v904_v59 }
  0x4c   : > { %1726 = vmatprep.mubr.msk.f32.mxu1 %vm244_vm1, %v185_v58 }
  0x4e   : > { %1779 = vmatmul.mubr.msk.f32.gmra.mxu0 %vm244_vm1, %v905_v61 }
  0x4f   : > { %1727 = vmatmul.mubr.msk.f32.gmra.mxu1 %vm244_vm1, %v186_v60  ;;  %1781 = vmatprep.mubr.msk.f32.mxu0 %vm244_vm1, %v906_v63 }
  0x50   : > { %1729 = vmatprep.mubr.msk.f32.mxu1 %vm244_vm1, %v187_v62 }
  0x52   : > { %1782 = vmatmul.mubr.msk.f32.gmra.mxu0 %vm244_vm1, %v907_v1 }
  0x53   : > { %1730 = vmatmul.mubr.msk.f32.gmra.mxu1 %vm244_vm1, %v188_v0  ;;  %1784 = vmatprep.mubr.msk.f32.mxu0 %vm244_vm1, %v908_v3 }
  0x54   : > { %1732 = vmatprep.mubr.msk.f32.mxu1 %vm244_vm1, %v189_v2 }
  0x56   : > { %1785 = vmatmul.mubr.msk.f32.gmra.mxu0 %vm244_vm1, %v909_v5 }
  0x57   : > { %1733 = vmatmul.mubr.msk.f32.gmra.mxu1 %vm244_vm1, %v190_v4  ;;  %1787 = vmatprep.mubr.msk.f32.mxu0 %vm244_vm1, %v910_v7 }
  0x58   : > { %1735 = vmatprep.mubr.msk.f32.mxu1 %vm244_vm1, %v191_v6 }
  0x5a   : > { %1788 = vmatmul.mubr.msk.f32.gmra.mxu0 %vm244_vm1, %v911_v9  ;;  %v2270_v9 = vld [vmem:[%s2448_s2] ss:$0 sm:$0xff] }
  0x5b   : > { %1736 = vmatmul.mubr.msk.f32.gmra.mxu1 %vm244_vm1, %v192_v8  ;;  %1790 = vmatprep.mubr.msk.f32.mxu0 %vm244_vm1, %v912_v11 }
  0x5c   : > { %1738 = vmatprep.mubr.msk.f32.mxu1 %vm244_vm1, %v193_v10 }
  0x5e   : > { %1791 = vmatmul.mubr.msk.f32.gmra.mxu0 %vm244_vm1, %v913_v13 }
  0x5f   : > { %1739 = vmatmul.mubr.msk.f32.gmra.mxu1 %vm244_vm1, %v194_v12  ;;  %1793 = vmatprep.mubr.msk.f32.mxu0 %vm244_vm1, %v914_v15 }
  0x60   : > { %1741 = vmatprep.mubr.msk.f32.mxu1 %vm244_vm1, %v195_v14 }
  0x62   : > { %1794 = vmatmul.mubr.msk.f32.gmra.mxu0 %vm244_vm1, %v915_v17 }
  0x63   : > { %1742 = vmatmul.mubr.msk.f32.gmra.mxu1 %vm244_vm1, %v196_v16  ;;  %1796 = vmatprep.mubr.msk.f32.mxu0 %vm244_vm1, %v916_v19 }
  0x64   : > { %1744 = vmatprep.mubr.msk.f32.mxu1 %vm244_vm1, %v197_v18 }
  0x66   : > { %1797 = vmatmul.mubr.msk.f32.gmra.mxu0 %vm244_vm1, %v917_v21 }
  0x67   : > { %1745 = vmatmul.mubr.msk.f32.gmra.mxu1 %vm244_vm1, %v198_v20  ;;  %1799 = vmatprep.mubr.msk.f32.mxu0 %vm244_vm1, %v918_v23 }
  0x68   : > { %1747 = vmatprep.mubr.msk.f32.mxu1 %vm244_vm1, %v199_v22 }
  0x6a   : > { %1800 = vmatmul.mubr.msk.f32.gmra.mxu0 %vm244_vm1, %v919_v25 }
  0x6b   : > { %1748 = vmatmul.mubr.msk.f32.gmra.mxu1 %vm244_vm1, %v200_v24  ;;  %1802 = vmatprep.mubr.msk.f32.mxu0 %vm244_vm1, %v920_v27 }
  0x6c   : > { %1750 = vmatprep.mubr.msk.f32.mxu1 %vm244_vm1, %v201_v26 }
  0x6e   : > { %1803 = vmatmul.mubr.msk.f32.gmra.mxu0 %vm244_vm1, %v921_v29 }
  0x6f   : > { %1751 = vmatmul.mubr.msk.f32.gmra.mxu1 %vm244_vm1, %v202_v28  ;;  %1805 = vmatprep.mubr.msk.f32.mxu0 %vm244_vm1, %v922_v31 }
  0x70   : > { %1753 = vmatprep.mubr.msk.f32.mxu1 %vm244_vm1, %v203_v30 }
  0x72   : > { %1806 = vmatmul.mubr.msk.f32.gmra.mxu0 %vm244_vm1, %v923_v33 }
  0x73   : > { %1754 = vmatmul.mubr.msk.f32.gmra.mxu1 %vm244_vm1, %v204_v32  ;;  %1808 = vmatprep.mubr.msk.f32.mxu0 %vm244_vm1, %v924_v35 }
  0x74   : > { %1756 = vmatprep.mubr.msk.f32.mxu1 %vm244_vm1, %v205_v34 }
  0x76   : > { %1809 = vmatmul.mubr.msk.f32.gmra.mxu0 %vm244_vm1, %v925_v37 }
  0x77   : > { %1757 = vmatmul.mubr.msk.f32.gmra.mxu1 %vm244_vm1, %v206_v36 }
  0xda   : > { %v1661_v38 = vpop.f32.mrf.mxu0 }
  0xdb   : > { %v2214_v39 = vpop.f32.mrf.mxu1 }
  0xdc   : > { %v411_v40 = vpop.f32.mrf.mxu0 }
  0xdd   : > { %v2216_v41 = vpop.f32.mrf.mxu1 }
  0xde   : > { %v1664_v42 = vpop.f32.mrf.mxu0 }
  0xdf   : > { %v2218_v43 = vpop.f32.mrf.mxu1 }
  0xe0   : > { %v421_v44 = vpop.f32.mrf.mxu0 }
  0xe1   : > { %v2220_v45 = vpop.f32.mrf.mxu1 }
  0xe2   : > { %v1667_v46 = vpop.f32.mrf.mxu0 }
  0xe3   : > { %v2222_v47 = vpop.f32.mrf.mxu1 }
  0xe4   : > { %v431_v48 = vpop.f32.mrf.mxu0 }
  0xe5   : > { %v2224_v49 = vpop.f32.mrf.mxu1 }
  0xe6   : > { %v1670_v50 = vpop.f32.mrf.mxu0 }
  0xe7   : > { %v2226_v51 = vpop.f32.mrf.mxu1 }
  0xe8   : > { %v2228_v52 = vpop.f32.mrf.mxu0 }
  0xe9   : > { %v2230_v53 = vpop.f32.mrf.mxu1 }
  0xea   : > { %v2232_v54 = vpop.f32.mrf.mxu0 }
  0xeb   : > { %v2234_v55 = vpop.f32.mrf.mxu1 }
  0xec   : > { %v2236_v56 = vpop.f32.mrf.mxu0 }
  0xed   : > { %v2238_v57 = vpop.f32.mrf.mxu1 }
  0xee   : > { %v2240_v58 = vpop.f32.mrf.mxu0 }
  0xef   : > { %v2242_v59 = vpop.f32.mrf.mxu1 }
  0xf0   : > { %v2244_v60 = vpop.f32.mrf.mxu0 }
  0xf1   : > { %v2246_v61 = vpop.f32.mrf.mxu1 }
  0xf2   : > { %v2248_v62 = vpop.f32.mrf.mxu0 }
  0xf3   : > { %v2250_v63 = vpop.f32.mrf.mxu1 }
  0xf4   : > { %v2252_v0 = vpop.f32.mrf.mxu0 }
  0xf5   : > { %v2254_v1 = vpop.f32.mrf.mxu1 }
  0xf6   : > { %v2256_v2 = vpop.f32.mrf.mxu0 }
  0xf7   : > { %v2258_v3 = vpop.f32.mrf.mxu1 }
  0xf8   : > { %v2260_v4 = vpop.f32.mrf.mxu0 }
  0xf9   : > { %v2262_v5 = vpop.f32.mrf.mxu1 }
  0xfa   : > { %v1765_v7 = vpop.f32.mrf.mxu0 }
  0xfb   : > { %v1713_v6 = vpop.f32.mrf.mxu1 }
  0xfc   : > { %v741_v8 = vadd.f32 %v1713_v6, %v1661_v38  ;;  %v1094_v11 = vpop.f32.mrf.mxu0 }
  0xfd   : > { %v735_v10 = vpop.f32.mrf.mxu1 }
  0xfe   : > { %v1254_v12 = vadd.f32 %v1765_v7, %v741_v8  ;;  %v736_v13 = vadd.f32 %v735_v10, %v411_v40  ;;  %v1768_v15 = vpop.f32.mrf.mxu0 }
  0xff   : > { %v1716_v14 = vpop.f32.mrf.mxu1 }
 0x100   : > { %v1293_v16 = vadd.f32 %v2270_v9, %v1254_v12  ;;  %v1253_v17 = vadd.f32 %v1094_v11, %v736_v13  ;;  %v751_v18 = vadd.f32 %v1716_v14, %v1664_v42  ;;  %v1104_v20 = vpop.f32.mrf.mxu0 }
 0x101   : > { %v745_v19 = vpop.f32.mrf.mxu1 }
 0x102   : > { %1326 = vst.msk [vmem:[%s2273_s27 + $0x8] sm:$0xff] %vm1324_vm2, %v1293_v16  ;;  %v1292_v21 = vadd.f32 %v2270_v9, %v1253_v17  ;;  %v1256_v22 = vadd.f32 %v1768_v15, %v751_v18  ;;  %v746_v23 = vadd.f32 %v745_v19, %v421_v44  ;;  %v1771_v25 = vpop.f32.mrf.mxu0 }
 0x103   : > { %v1719_v24 = vpop.f32.mrf.mxu1 }
 0x104   : > { %1325 = vst.msk [vmem:[%s2273_s27] sm:$0xff] %vm1324_vm2, %v1292_v21  ;;  %v1295_v26 = vadd.f32 %v2270_v9, %v1256_v22  ;;  %v1255_v27 = vadd.f32 %v1104_v20, %v746_v23  ;;  %v761_v28 = vadd.f32 %v1719_v24, %v1667_v46  ;;  %v1114_v30 = vpop.f32.mrf.mxu0 }
 0x105   : > { %v755_v29 = vpop.f32.mrf.mxu1 }
 0x106   : > { %1328 = vst.msk [vmem:[%s2273_s27 + $0x18] sm:$0xff] %vm1324_vm2, %v1295_v26  ;;  %v1294_v31 = vadd.f32 %v2270_v9, %v1255_v27  ;;  %v1258_v32 = vadd.f32 %v1771_v25, %v761_v28  ;;  %v756_v33 = vadd.f32 %v755_v29, %v431_v48  ;;  %v1774_v35 = vpop.f32.mrf.mxu0 }
 0x107   : > { %v1722_v34 = vpop.f32.mrf.mxu1 }
 0x108   : > { %1327 = vst.msk [vmem:[%s2273_s27 + $0x10] sm:$0xff] %vm1324_vm2, %v1294_v31  ;;  %v1297_v36 = vadd.f32 %v2270_v9, %v1258_v32  ;;  %v1257_v37 = vadd.f32 %v1114_v30, %v756_v33  ;;  %v771_v38 = vadd.f32 %v1722_v34, %v1670_v50  ;;  %v1124_v42 = vpop.f32.mrf.mxu0 }
 0x109   : > { %v765_v40 = vpop.f32.mrf.mxu1 }
 0x10a   : > { %1330 = vst.msk [vmem:[%s2273_s27 + $0x28] sm:$0xff] %vm1324_vm2, %v1297_v36  ;;  %v1296_v44 = vadd.f32 %v2270_v9, %v1257_v37  ;;  %v1260_v46 = vadd.f32 %v1774_v35, %v771_v38  ;;  %v766_v6 = vadd.f32 %v765_v40, %v2228_v52  ;;  %v1777_v7 = vpop.f32.mrf.mxu0 }
 0x10b   : > { %v1725_v48 = vpop.f32.mrf.mxu1 }
 0x10c   : > { %1329 = vst.msk [vmem:[%s2273_s27 + $0x20] sm:$0xff] %vm1324_vm2, %v1296_v44  ;;  %v1299_v8 = vadd.f32 %v2270_v9, %v1260_v46  ;;  %v1259_v10 = vadd.f32 %v1124_v42, %v766_v6  ;;  %v781_v50 = vadd.f32 %v1725_v48, %v2232_v54  ;;  %v1134_v12 = vpop.f32.mrf.mxu0 }
 0x10d   : > { %v775_v11 = vpop.f32.mrf.mxu1 }
 0x10e   : > { %1332 = vst.msk [vmem:[%s2273_s27 + $0x38] sm:$0xff] %vm1324_vm2, %v1299_v8  ;;  %v1298_v13 = vadd.f32 %v2270_v9, %v1259_v10  ;;  %v1262_v14 = vadd.f32 %v1777_v7, %v781_v50  ;;  %v776_v52 = vadd.f32 %v775_v11, %v2236_v56  ;;  %v1780_v16 = vpop.f32.mrf.mxu0 }
 0x10f   : > { %v1728_v15 = vpop.f32.mrf.mxu1 }
 0x110   : > { %1331 = vst.msk [vmem:[%s2273_s27 + $0x30] sm:$0xff] %vm1324_vm2, %v1298_v13  ;;  %v1301_v17 = vadd.f32 %v2270_v9, %v1262_v14  ;;  %v1261_v18 = vadd.f32 %v1134_v12, %v776_v52  ;;  %v791_v54 = vadd.f32 %v1728_v15, %v2240_v58  ;;  %v1144_v20 = vpop.f32.mrf.mxu0 }
 0x111   : > { %v785_v19 = vpop.f32.mrf.mxu1 }
 0x112   : > { %1334 = vst.msk [vmem:[%s2273_s27 + $0x48] sm:$0xff] %vm1324_vm2, %v1301_v17  ;;  %v1300_v21 = vadd.f32 %v2270_v9, %v1261_v18  ;;  %v1264_v22 = vadd.f32 %v1780_v16, %v791_v54  ;;  %v786_v56 = vadd.f32 %v785_v19, %v2244_v60  ;;  %v1783_v24 = vpop.f32.mrf.mxu0 }
 0x113   : > { %v1731_v23 = vpop.f32.mrf.mxu1 }
 0x114   : > { %1333 = vst.msk [vmem:[%s2273_s27 + $0x40] sm:$0xff] %vm1324_vm2, %v1300_v21  ;;  %v1303_v25 = vadd.f32 %v2270_v9, %v1264_v22  ;;  %v1263_v26 = vadd.f32 %v1144_v20, %v786_v56  ;;  %v801_v58 = vadd.f32 %v1731_v23, %v2248_v62  ;;  %v1154_v28 = vpop.f32.mrf.mxu0 }
 0x115   : > { %v795_v27 = vpop.f32.mrf.mxu1 }
 0x116   : > { %1336 = vst.msk [vmem:[%s2273_s27 + $0x58] sm:$0xff] %vm1324_vm2, %v1303_v25  ;;  %v1302_v29 = vadd.f32 %v2270_v9, %v1263_v26  ;;  %v1266_v30 = vadd.f32 %v1783_v24, %v801_v58  ;;  %v796_v60 = vadd.f32 %v795_v27, %v2252_v0  ;;  %v1786_v32 = vpop.f32.mrf.mxu0 }
 0x117   : > { %v1734_v31 = vpop.f32.mrf.mxu1 }
 0x118   : > { %1335 = vst.msk [vmem:[%s2273_s27 + $0x50] sm:$0xff] %vm1324_vm2, %v1302_v29  ;;  %v1305_v33 = vadd.f32 %v2270_v9, %v1266_v30  ;;  %v1265_v34 = vadd.f32 %v1154_v28, %v796_v60  ;;  %v811_v62 = vadd.f32 %v1734_v31, %v2256_v2  ;;  %v1164_v36 = vpop.f32.mrf.mxu0 }
 0x119   : > { %v805_v35 = vpop.f32.mrf.mxu1 }
 0x11a   : > { %1338 = vst.msk [vmem:[%s2273_s27 + $0x68] sm:$0xff] %vm1324_vm2, %v1305_v33  ;;  %v1304_v37 = vadd.f32 %v2270_v9, %v1265_v34  ;;  %v1268_v38 = vadd.f32 %v1786_v32, %v811_v62  ;;  %v806_v0 = vadd.f32 %v805_v35, %v2260_v4  ;;  %v1789_v42 = vpop.f32.mrf.mxu0 }
 0x11b   : > { %v1737_v40 = vpop.f32.mrf.mxu1 }
 0x11c   : > { %1337 = vst.msk [vmem:[%s2273_s27 + $0x60] sm:$0xff] %vm1324_vm2, %v1304_v37  ;;  %v1307_v44 = vadd.f32 %v2270_v9, %v1268_v38  ;;  %v1267_v46 = vadd.f32 %v1164_v36, %v806_v0  ;;  %v821_v2 = vadd.f32 %v1737_v40, %v2214_v39  ;;  %v1174_v48 = vpop.f32.mrf.mxu0 }
 0x11d   : > { %v815_v6 = vpop.f32.mrf.mxu1 }
 0x11e   : > { %1340 = vst.msk [vmem:[%s2273_s27 + $0x78] sm:$0xff] %vm1324_vm2, %v1307_v44  ;;  %v1306_v7 = vadd.f32 %v2270_v9, %v1267_v46  ;;  %v1270_v8 = vadd.f32 %v1789_v42, %v821_v2  ;;  %v816_v4 = vadd.f32 %v815_v6, %v2216_v41  ;;  %v1792_v50 = vpop.f32.mrf.mxu0 }
 0x11f   : > { %v1740_v10 = vpop.f32.mrf.mxu1 }
 0x120   : > { %1339 = vst.msk [vmem:[%s2273_s27 + $0x70] sm:$0xff] %vm1324_vm2, %v1306_v7  ;;  %v1309_v11 = vadd.f32 %v2270_v9, %v1270_v8  ;;  %v1269_v12 = vadd.f32 %v1174_v48, %v816_v4  ;;  %v831_v39 = vadd.f32 %v1740_v10, %v2218_v43  ;;  %v1184_v14 = vpop.f32.mrf.mxu0 }
 0x121   : > { %v825_v13 = vpop.f32.mrf.mxu1 }
 0x122   : > { %1342 = vst.msk [vmem:[%s2273_s27 + $0x88] sm:$0xff] %vm1324_vm2, %v1309_v11  ;;  %v1308_v52 = vadd.f32 %v2270_v9, %v1269_v12  ;;  %v1272_v15 = vadd.f32 %v1792_v50, %v831_v39  ;;  %v826_v41 = vadd.f32 %v825_v13, %v2220_v45  ;;  %v1795_v17 = vpop.f32.mrf.mxu0 }
 0x123   : > { %v1743_v16 = vpop.f32.mrf.mxu1 }
 0x124   : > { %1341 = vst.msk [vmem:[%s2273_s27 + $0x80] sm:$0xff] %vm1324_vm2, %v1308_v52  ;;  %v1311_v18 = vadd.f32 %v2270_v9, %v1272_v15  ;;  %v1271_v54 = vadd.f32 %v1184_v14, %v826_v41  ;;  %v841_v43 = vadd.f32 %v1743_v16, %v2222_v47  ;;  %v1194_v20 = vpop.f32.mrf.mxu0 }
 0x125   : > { %v835_v19 = vpop.f32.mrf.mxu1 }
 0x126   : > { %1344 = vst.msk [vmem:[%s2273_s27 + $0x98] sm:$0xff] %vm1324_vm2, %v1311_v18  ;;  %v1310_v21 = vadd.f32 %v2270_v9, %v1271_v54  ;;  %v1274_v22 = vadd.f32 %v1795_v17, %v841_v43  ;;  %v836_v45 = vadd.f32 %v835_v19, %v2224_v49  ;;  %v1798_v23 = vpop.f32.mrf.mxu0 }
 0x127   : > { %v1746_v56 = vpop.f32.mrf.mxu1 }
 0x128   : > { %1343 = vst.msk [vmem:[%s2273_s27 + $0x90] sm:$0xff] %vm1324_vm2, %v1310_v21  ;;  %v1313_v24 = vadd.f32 %v2270_v9, %v1274_v22  ;;  %v1273_v25 = vadd.f32 %v1194_v20, %v836_v45  ;;  %v851_v47 = vadd.f32 %v1746_v56, %v2226_v51  ;;  %v1204_v58 = vpop.f32.mrf.mxu0 }
 0x129   : > { %v845_v26 = vpop.f32.mrf.mxu1 }
 0x12a   : > { %1346 = vst.msk [vmem:[%s2273_s27 + $0xa8] sm:$0xff] %vm1324_vm2, %v1313_v24  ;;  %v1312_v27 = vadd.f32 %v2270_v9, %v1273_v25  ;;  %v1276_v28 = vadd.f32 %v1798_v23, %v851_v47  ;;  %v846_v49 = vadd.f32 %v845_v26, %v2230_v53  ;;  %v1801_v30 = vpop.f32.mrf.mxu0 }
 0x12b   : > { %v1749_v29 = vpop.f32.mrf.mxu1 }
 0x12c   : > { %1345 = vst.msk [vmem:[%s2273_s27 + $0xa0] sm:$0xff] %vm1324_vm2, %v1312_v27  ;;  %v1315_v60 = vadd.f32 %v2270_v9, %v1276_v28  ;;  %v1275_v31 = vadd.f32 %v1204_v58, %v846_v49  ;;  %v861_v51 = vadd.f32 %v1749_v29, %v2234_v55  ;;  %v1214_v33 = vpop.f32.mrf.mxu0 }
 0x12d   : > { %v855_v32 = vpop.f32.mrf.mxu1 }
 0x12e   : > { %1348 = vst.msk [vmem:[%s2273_s27 + $0xb8] sm:$0xff] %vm1324_vm2, %v1315_v60  ;;  %v1314_v34 = vadd.f32 %v2270_v9, %v1275_v31  ;;  %v1278_v62 = vadd.f32 %v1801_v30, %v861_v51  ;;  %v856_v53 = vadd.f32 %v855_v32, %v2238_v57  ;;  %v1804_v36 = vpop.f32.mrf.mxu0 }
 0x12f   : > { %v1752_v35 = vpop.f32.mrf.mxu1 }
 0x130   : > { %1347 = vst.msk [vmem:[%s2273_s27 + $0xb0] sm:$0xff] %vm1324_vm2, %v1314_v34  ;;  %v1317_v37 = vadd.f32 %v2270_v9, %v1278_v62  ;;  %v1277_v38 = vadd.f32 %v1214_v33, %v856_v53  ;;  %v871_v55 = vadd.f32 %v1752_v35, %v2242_v59  ;;  %v1224_v40 = vpop.f32.mrf.mxu0 }
 0x131   : > { %v865_v0 = vpop.f32.mrf.mxu1 }
 0x132   : > { %1350 = vst.msk [vmem:[%s2273_s27 + $0xc8] sm:$0xff] %vm1324_vm2, %v1317_v37  ;;  %v1316_v42 = vadd.f32 %v2270_v9, %v1277_v38  ;;  %v1280_v44 = vadd.f32 %v1804_v36, %v871_v55  ;;  %v866_v57 = vadd.f32 %v865_v0, %v2246_v61  ;;  %v1807_v2 = vpop.f32.mrf.mxu0 }
 0x133   : > { %v1755_v46 = vpop.f32.mrf.mxu1 }
 0x134   : > { %1349 = vst.msk [vmem:[%s2273_s27 + $0xc0] sm:$0xff] %vm1324_vm2, %v1316_v42  ;;  %v1319_v6 = vadd.f32 %v2270_v9, %v1280_v44  ;;  %v1279_v48 = vadd.f32 %v1224_v40, %v866_v57  ;;  %v881_v59 = vadd.f32 %v1755_v46, %v2250_v63  ;;  %v1234_v8 = vpop.f32.mrf.mxu0 }
 0x135   : > { %v875_v7 = vpop.f32.mrf.mxu1 }
 0x136   : > { %1352 = vst.msk [vmem:[%s2273_s27 + $0xd8] sm:$0xff] %vm1324_vm2, %v1319_v6  ;;  %v1318_v4 = vadd.f32 %v2270_v9, %v1279_v48  ;;  %v1282_v10 = vadd.f32 %v1807_v2, %v881_v59  ;;  %v876_v61 = vadd.f32 %v875_v7, %v2254_v1  ;;  %v1810_v11 = vpop.f32.mrf.mxu0 }
 0x137   : > { %v1758_v50 = vpop.f32.mrf.mxu1 }
 0x138   : > { %1351 = vst.msk [vmem:[%s2273_s27 + $0xd0] sm:$0xff] %vm1324_vm2, %v1318_v4  ;;  %v1321_v12 = vadd.f32 %v2270_v9, %v1282_v10  ;;  %v1281_v63 = vadd.f32 %v1234_v8, %v876_v61  ;;  %v891_v39 = vadd.f32 %v1758_v50, %v2258_v3  ;;  %v1244_v15 = vpop.f32.mrf.mxu0 }
 0x139   : > { %v885_v13 = vpop.f32.mrf.mxu1 }
 0x13a   : > { %1354 = vst.msk [vmem:[%s2273_s27 + $0xe8] sm:$0xff] %vm1324_vm2, %v1321_v12  ;;  %v1320_v14 = vadd.f32 %v2270_v9, %v1281_v63  ;;  %v1284_v52 = vadd.f32 %v1810_v11, %v891_v39  ;;  %v886_v1 = vadd.f32 %v885_v13, %v2262_v5 }
 0x13c   : > { %1353 = vst.msk [vmem:[%s2273_s27 + $0xe0] sm:$0xff] %vm1324_vm2, %v1320_v14  ;;  %v1323_v41 = vadd.f32 %v2270_v9, %v1284_v52  ;;  %v1283_v16 = vadd.f32 %v1244_v15, %v886_v1 }
 0x13e   : > { %1356 = vst.msk [vmem:[%s2273_s27 + $0xf8] sm:$0xff] %vm1324_vm2, %v1323_v41  ;;  %v1322_v3 = vadd.f32 %v2270_v9, %v1283_v16 }
 0x140   : > { %1355 = vst.msk [vmem:[%s2273_s27 + $0xf0] sm:$0xff] %vm1324_vm2, %v1322_v3 }
 0x141   : > { %1870 = shalt.err (!%p1867_p3)
}
 0x142   : > { %s1871_s10 = scalar_lea.hbm %s2395_s5, 4096  ;;  %s1875_s19 = scalar_lea.hbm %s2449_s3, 8192 }
 0x143   : > { %p1872_p4 = scmp.ne.s32.totalorder %s2395_s5, %s1871_s10  ;;  %p1876_p9 = scmp.lt.s32.totalorder %s2395_s5, %s2449_s3 }
 0x144   : > { %p1877_p10 = scmp.lt.s32.totalorder %s1875_s19, %s1871_s10 }
 0x145   : > { %p1873_p7 = pnand %p1872_p4, %p1980_p5 }
 0x146   : > { %p1878_p11 = por %p1877_p10, %p1876_p9 }
 0x147   : > { %p1874_p8 = pneg %p1873_p7 }
 0x149   : > { %p1879_p12 = pnand %p1878_p11, %p1874_p8 }
 0x14b   : > { %1882 = shalt.err (!%p1879_p12)
}
 0x14c   : > { %s1920_s25 = smov 128   ;;  %s1921_s26 = smov 8  }
 0x14d   : > { %1816 = dma.vmem_to_hbm [thread:$0]  (%p1980_p5), %s2397_s29, 4096, %s2395_s5, %s2406_s16, %s1920_s25, %s1920_s25, %s1921_s26  }
 0x14e PF: > { %p1822_p13 = scmp.ge.s32.totalorder %s1917_s15, 2  ;;  %s1387_s27 = sand.u32 1, %s1905_s12  }
 0x14f   : > { %s1388_s28 = scalar_lea.sflag [#allocation3], %s1387_s27 }
 0x150   : > { %p1819_p0 = pnand %p1822_p13, %p1984_p6 }
 0x152   : > { %p1820_p1 = pneg %p1819_p0 }
 0x154   : > { %1900 = dma.done.wait (%p1820_p1), %s1388_s28, 4096  }
 0x155   : > { %1902 = vsyncadd (%p1820_p1), %s1388_s28, 4294963200  ;;  %p13_p2 = scmp.ge.s32.totalorder %s1967_s18, 4   ;;  %s2452_s12 = smov %s1909_s13 }
 0x156   : > { %s2453_s13 = smov %s1913_s14  ;;  %s2454_s14 = smov %s1978_s21 }
 0x157   : > { %s2455_s15 = smov %s1967_s18  ;;  %15 = sbr.rel (!%p13_p2) target bundleno = 3 (0x3), region = 69 }
 0x15c   :  { %1393 = vsyncpa [#allocation3], 1 }
 0x15d   :  { %1395 = vsyncpa [#allocation3 + $0x1], 1 }

</bundles_post_ra>
